<compile_context>
chip_gen: v7x
topology: tpu7x:2x2x1
jax: 0.10.0
libtpu: 0.0.40
codegen_flags: <defaults>
</compile_context>

<pallas_src>
import jax
import jax.numpy as jnp
from jax.experimental import pallas as pl
from jax.experimental.pallas import tpu as pltpu


_MAX_BATCH_BLOCK = 8  # bound the static in-kernel unroll over batch images


def _round_up(x, m):
    return ((x + m - 1) // m) * m


def _conv1x1_kernel(w_ref, x_ref, o_ref):
    # w_ref: (C_out, C_in)
    # x_ref: (B_blk, C_in, T_HW)   lane axis = pixels (lane-dense)
    # o_ref: (B_blk, C_out, T_HW)
    w = w_ref[...]
    for b in range(x_ref.shape[0]):  # static, small (<= _MAX_BATCH_BLOCK)
        o_ref[b] = jnp.dot(
            w, x_ref[b], preferred_element_type=jnp.float32
        ).astype(o_ref.dtype)


def _pixel_budget():
    """Per-grid-step pixel budget (b_n * t_hw), chosen per TPU generation.

    With C=64 f32, budget 16384 -> 4 MiB blocks -> 16 MiB of double-buffered
    in+out (fits the 32 MiB scoped-VMEM default on v6e/v7x); budget 4096 ->
    1 MiB blocks -> 4 MiB of buffers (fits v5e's 16 MiB default & any fallback).
    """
    try:
        kind = jax.devices()[0].device_kind.lower()
    except Exception:
        kind = ""
    if ("v6" in kind) or ("v7" in kind):
        return 16384
    return 4096


def _select_tiling(n, hw, budget):
    hw_pad = _round_up(hw, 128)
    if hw_pad >= budget:
        # Large feature maps: tile the pixel axis, one image per grid step.
        b_n, t_hw = 1, budget
    else:
        # Small feature maps: whole (padded) pixel extent per step and several
        # images blocked together to amortize the fixed per-step overhead.
        b_n = max(1, min(n, budget // hw_pad, _MAX_BATCH_BLOCK))
        t_hw = hw_pad
    # Guarantee >= 2 grid points when possible so v7x's two TensorCores both
    # get work ("parallel" axes); costs ~nothing on single-TC v5e/v6e.
    if pl.cdiv(n, b_n) * pl.cdiv(hw, t_hw) < 2:
        if n >= 2:
            b_n = (n + 1) // 2
        elif hw > 128:
            t_hw = _round_up((hw + 1) // 2, 128)
    return b_n, t_hw


@jax.jit
def adapt_forward(x_nchw, weight_oc_ic):
    """Adapt.forward: 1x1 conv, no bias, computed directly in NCHW layout.

    x_nchw:       (N, C_in, H, W)
    weight_oc_ic: (C_out, C_in)  (Conv2d weight squeezed from (C_out, C_in, 1, 1))
    returns       (N, C_out, H, W)
    """
    n, c_in, h, w = x_nchw.shape
    c_out = weight_oc_ic.shape[0]
    hw = h * w

    # Free, contiguous view: (N, C_in, H*W).
    x3 = x_nchw.reshape(n, c_in, hw)

    b_n, t_hw = _select_tiling(n, hw, _pixel_budget())
    grid = (pl.cdiv(n, b_n), pl.cdiv(hw, t_hw))

    itemsize = x_nchw.dtype.itemsize
    cost = pl.CostEstimate(
        flops=2 * n * c_out * c_in * hw,
        transcendentals=0,
        bytes_accessed=itemsize * (n * c_in * hw + n * c_out * hw)
        + weight_oc_ic.dtype.itemsize * c_out * c_in,
    )

    y3 = pl.pallas_call(
        _conv1x1_kernel,
        out_shape=jax.ShapeDtypeStruct((n, c_out, hw), x_nchw.dtype),
        grid_spec=pltpu.PrefetchScalarGridSpec(
            num_scalar_prefetch=0,
            grid=grid,
            in_specs=[
                # Weight: constant block index -> fetched once, stays resident.
                pl.BlockSpec((c_out, c_in), lambda i, j: (0, 0)),
                # Activations: (batch tile, all channels, pixel tile).
                pl.BlockSpec((b_n, c_in, t_hw), lambda i, j: (i, 0, j)),
            ],
            out_specs=pl.BlockSpec((b_n, c_out, t_hw), lambda i, j: (i, 0, j)),
        ),
        compiler_params=pltpu.CompilerParams(
            dimension_semantics=("parallel", "parallel"),
        ),
        cost_estimate=cost,
    )(weight_oc_ic, x3)

    # Free reshape back to NCHW.
    return y3.reshape(n, c_out, h, w)


def _reference(x_nchw, weight_oc_ic):
    # Plain-JAX 1x1 conv (einsum over the channel axis).
    return jnp.einsum("nchw,oc->nohw", x_nchw, weight_oc_ic)


if __name__ == "__main__":
    key = jax.random.PRNGKey(0)
    k_w, k_x1, k_x2, k_x3 = jax.random.split(key, 4)

    # Shapes consistent with the module (Adapt inchannels=64 default).
    C = 64
    bound = 1.0 / jnp.sqrt(jnp.float32(C))
    weight = jax.random.uniform(
        k_w, (C, C), minval=-bound, maxval=bound, dtype=jnp.float32
    )

    # Case 1: small feature map, batch 2.
    x1 = jax.random.normal(k_x1, (2, C, 16, 16), dtype=jnp.float32)
    y1 = jax.block_until_ready(adapt_forward(x1, weight))
    assert y1.shape == (2, C, 16, 16)
    assert jnp.allclose(y1, _reference(x1, weight), atol=1e-4, rtol=1e-5), "c1 mismatch"

    # Case 2: ragged H*W (not a multiple of 128) -> boundary-padded pixel tile.
    x2 = jax.random.normal(k_x2, (2, C, 15, 15), dtype=jnp.float32)
    y2 = jax.block_until_ready(adapt_forward(x2, weight))
    assert y2.shape == (2, C, 15, 15)
    assert jnp.allclose(y2, _reference(x2, weight), atol=1e-4, rtol=1e-5), "c2 mismatch"

    # Case 3: batch blocking with a ragged batch tail (N=5 -> b_n=3, 2 tiles).
    x3 = jax.random.normal(k_x3, (5, C, 16, 16), dtype=jnp.float32)
    y3 = jax.block_until_ready(adapt_forward(x3, weight))
    assert y3.shape == (5, C, 16, 16)
    assert jnp.allclose(y3, _reference(x3, weight), atol=1e-4, rtol=1e-5), "c3 mismatch"

    print("KERNEL_OK")
</pallas_src>

<mosaic_0001>
module attributes {stable_mosaic.version = 11 : i64} {
  func.func @_conv1x1_kernel(%arg0: i32, %arg1: i32, %arg2: memref<64x64xf32, #tpu.memory_space<vmem>>, %arg3: memref<1x64x256xf32, #tpu.memory_space<vmem>>, %arg4: memref<1x64x256xf32, #tpu.memory_space<vmem>>) attributes {dimension_semantics = [#tpu.dimension_semantics<parallel>, #tpu.dimension_semantics<parallel>], iteration_bounds = array<i64: 2, 1>, scalar_prefetch = 0 : i64, scratch_operands = 0 : i64, tpu.core_type = #tpu.core_type<tc>, window_params = [{pipeline_mode = #tpu.pipeline_mode<synchronous>, transform_indices = @transform_0, window_bounds = array<i64: 64, 64>}, {transform_indices = @transform_1, window_bounds = array<i64: 1, 64, 256>}, {transform_indices = @transform_2, window_bounds = array<i64: 1, 64, 256>}]} {
    %c0 = arith.constant 0 : index
    %c0_0 = arith.constant 0 : index
    %0 = vector.load %arg2[%c0, %c0_0] : memref<64x64xf32, #tpu.memory_space<vmem>>, vector<64x64xf32>
    %c0_1 = arith.constant 0 : index
    %c0_2 = arith.constant 0 : index
    %c0_3 = arith.constant 0 : index
    %1 = vector.load %arg3[%c0_1, %c0_2, %c0_3] : memref<1x64x256xf32, #tpu.memory_space<vmem>>, vector<1x64x256xf32>
    %2 = vector.shape_cast %1 : vector<1x64x256xf32> to vector<64x256xf32>
    %cst = arith.constant dense<0.000000e+00> : vector<64x256xf32>
    %3 = tpu.matmul %0, %2, %cst {dimension_numbers = #tpu.dot_dimension_numbers<[1], [0], [0], [1], [0, 0, 1, 1], [], []>} : vector<64x64xf32>, vector<64x256xf32>, vector<64x256xf32> -> vector<64x256xf32>
    %c0_4 = arith.constant 0 : index
    %c0_5 = arith.constant 0 : index
    %c0_6 = arith.constant 0 : index
    %4 = vector.load %arg4[%c0_4, %c0_5, %c0_6] : memref<1x64x256xf32, #tpu.memory_space<vmem>>, vector<1x64x256xf32>
    %5 = vector.shape_cast %4 : vector<1x64x256xf32> to vector<64x256xf32>
    %6 = vector.shape_cast %3 : vector<64x256xf32> to vector<1x64x256xf32>
    tpu.vector_store %arg4[%c0_4, %c0_5, %c0_6], %6 {strides = array<i32>} : memref<1x64x256xf32, #tpu.memory_space<vmem>>, vector<1x64x256xf32>,
    return
  }
  func.func @transform_0(%arg0: i32, %arg1: i32) -> (i32, i32) {
    %c0_i32 = arith.constant 0 : i32
    %c0_i32_0 = arith.constant 0 : i32
    %c0_i32_1 = arith.constant 0 : i32
    return %c0_i32, %c0_i32_0 : i32, i32
  }
  func.func @transform_1(%arg0: i32, %arg1: i32) -> (i32, i32, i32) {
    %c0_i32 = arith.constant 0 : i32
    %c0_i32_0 = arith.constant 0 : i32
    return %arg0, %c0_i32, %arg1 : i32, i32, i32
  }
  func.func @transform_2(%arg0: i32, %arg1: i32) -> (i32, i32, i32) {
    %c0_i32 = arith.constant 0 : i32
    %c0_i32_0 = arith.constant 0 : i32
    return %arg0, %c0_i32, %arg1 : i32, i32, i32
  }
}

</mosaic_0001>

<bundles_post_ra>
// kernel: adapt_forward.1
= control target key start
LH: loop header
LB: loop body
LE: loop exit
PB: predicated region body
PF: predicated region fallthrough
CT: control target
= control target key end

     0   :  { %s558_s9 = smov 0   ;;  %s560_s10 = smov 0   ;;  %s674_s0 = inlined_call_operand.vmem [shape: f32[64,64], index: 0, kind: input, shape index: {}]   ;;  %s675_s1 = inlined_call_operand.vmem [shape: f32[2,64,256], index: 1, kind: input, shape index: {}]   ;;  %s676_s2 = inlined_call_operand.vmem [shape: f32[2,64,256], index: 2, kind: output, shape index: {}]  }
   0x1   :  { %s562_s11 = smov 0  }
   0x2 LB: > { %s24_s12 = sadd.s32 1, %s536_s10  ;;  %p452_p0 = scmp.ge.s32.totalorder %s540_s11, 1  ;;  %s540_s11 = sphi %s562_s11, %s12_s11   ;;  %s536_s10 = sphi %s560_s10, %s678_s10   ;;  %s532_s9 = sphi %s558_s9, %s677_s9  }
   0x3   : > { %p26_p1 = scmp.ge.s32.totalorder %s24_s12, 2  ;;  %p133_p2 = scmp.lt.s32.totalorder %s540_s11, 3 }
   0x5   : > { %s680_s12 = smov (%p26_p1, %s24_s12), 0  ;;  %p134_p3 = pnand %p452_p0, %p133_p2 }
   0x6   : > { %p164_p4 = scmp.lt.s32.totalorder (!%p134_p3), %s532_s9, 1  ;;  %v542_v0 = vmov (!%p134_p3), 0.0   ;;  %v183_v25 = vld [vmem:[%s674_s0] sm:$0xff] (!%p134_p3)  ;;  %vm207_vm0 = vcmask (!%p134_p3), 523264   ;;  %v184_v27 = vld [vmem:[%s674_s0 + $0x8] sm:$0xff] (!%p134_p3)  ;;  %v185_v29 = vld [vmem:[%s674_s0 + $0x10] sm:$0xff] (!%p134_p3) }
   0x7   : > { %137 = sbr.rel (%p134_p3) target bundleno = 262 (0x106), region = 28  ;;  %296 = vmatprep.mubr.f32.mxu0 (!%p134_p3), %v542_v0  ;;  %320 = vmatprep.mubr.f32.mxu1 (!%p134_p3), %v542_v0  ;;  %v187_v26 = vld [vmem:[%s674_s0 + $0x20] sm:$0xff] (!%p134_p3)  ;;  %v188_v28 = vld [vmem:[%s674_s0 + $0x28] sm:$0xff] (!%p134_p3)  ;;  %v189_v30 = vld [vmem:[%s674_s0 + $0x30] sm:$0xff] (!%p134_p3) }
   0x8   : > { %v186_v31 = vld [vmem:[%s674_s0 + $0x18] sm:$0xff] (!%p134_p3) }
   0x9   : > { %v190_v32 = vld [vmem:[%s674_s0 + $0x38] sm:$0xff] (!%p134_p3) }
   0xe   : > { %s682_s9 = smov (!%p164_p4, %s532_s9), 1 }
   0xf   : > { %s467_s13 = sshll.u32 %s682_s9, 7 }
  0x10   : > { %s586_s16 = scalar_lea.vmem %s675_s1, %s467_s13  ;;  %s647_s7 = scalar_lea.vmem %s676_s2, %s467_s13 }
  0x11   : > { %v192_v1 = vld [vmem:[%s586_s16 + $0x8] sm:$0xff]  ;;  %v194_v2 = vld [vmem:[%s586_s16 + $0x18] sm:$0xff]  ;;  %v191_v3 = vld [vmem:[%s586_s16] sm:$0xff] }
  0x12   : > { %v469_v4 = vpack.c.bf16 %v194_v2, %v192_v1  ;;  %v193_v5 = vld [vmem:[%s586_s16 + $0x10] sm:$0xff]  ;;  %v196_v6 = vld [vmem:[%s586_s16 + $0x28] sm:$0xff]  ;;  %v198_v7 = vld [vmem:[%s586_s16 + $0x38] sm:$0xff] }
  0x13   : > { %v471_v8 = vpack.c.bf16 %v193_v5, %v191_v3  ;;  %v473_v9 = vpack.c.bf16 %v198_v7, %v196_v6  ;;  %v195_v10 = vld [vmem:[%s586_s16 + $0x20] sm:$0xff]  ;;  %v197_v11 = vld [vmem:[%s586_s16 + $0x30] sm:$0xff]  ;;  %v200_v12 = vld [vmem:[%s586_s16 + $0x48] sm:$0xff] }
  0x14   : > { %470 = vmatprep.subr.bf16.mxu0 %v469_v4  ;;  %485 = vmatprep.subr.bf16.mxu1 %v469_v4  ;;  %v202_v13 = vld [vmem:[%s586_s16 + $0x58] sm:$0xff]  ;;  %v475_v14 = vpack.c.bf16 %v197_v11, %v195_v10  ;;  %v199_v16 = vld [vmem:[%s586_s16 + $0x40] sm:$0xff]  ;;  %v201_v17 = vld [vmem:[%s586_s16 + $0x50] sm:$0xff] }
  0x15   : > { %472 = vmatpush1.bf16.msra.mxu0 %v471_v8  ;;  %489 = vmatpush1.bf16.msra.mxu1 %v471_v8  ;;  %v477_v15 = vpack.c.bf16 %v202_v13, %v200_v12  ;;  %v204_v18 = vld [vmem:[%s586_s16 + $0x68] sm:$0xff]  ;;  %v206_v19 = vld [vmem:[%s586_s16 + $0x78] sm:$0xff]  ;;  %v479_v20 = vpack.c.bf16 %v201_v17, %v199_v16  ;;  %v203_v22 = vld [vmem:[%s586_s16 + $0x60] sm:$0xff] }
  0x16   : > { %474 = vmatprep.subr.bf16.mxu0 %v473_v9  ;;  %486 = vmatprep.subr.bf16.mxu1 %v473_v9  ;;  %v481_v21 = vpack.c.bf16 %v206_v19, %v204_v18  ;;  %v205_v23 = vld [vmem:[%s586_s16 + $0x70] sm:$0xff] }
  0x17   : > { %v483_v24 = vpack.c.bf16 %v205_v23, %v203_v22 }
  0x19   : > { %476 = vmatpush1.bf16.msra.mxu0 %v475_v14  ;;  %490 = vmatpush1.bf16.msra.mxu1 %v475_v14 }
  0x1a   : > { %478 = vmatprep.subr.bf16.mxu0 %v477_v15  ;;  %487 = vmatprep.subr.bf16.mxu1 %v477_v15 }
  0x1d   : > { %480 = vmatpush1.bf16.msra.mxu0 %v479_v20  ;;  %491 = vmatpush1.bf16.msra.mxu1 %v479_v20 }
  0x1e   : > { %482 = vmatprep.subr.bf16.mxu0 %v481_v21  ;;  %488 = vmatprep.subr.bf16.mxu1 %v481_v21 }
  0x21   : > { %484 = vmatpush1.bf16.msra.mxu0 %v483_v24  ;;  %492 = vmatpush1.bf16.msra.mxu1 %v483_v24 }
  0x24   : > { %457 = vmatmul.mubr.msk.f32.vlgmr.msra.gmra.mrb[0].mxu0 %vm207_vm0, %v183_v25  ;;  %461 = vmatmul.mubr.msk.f32.vlgmr.msra.gmra.mrb[0].mxu1 %vm207_vm0, %v187_v26 }
  0x25   : > { %302 = vmatprep.mubr.f32.mxu0 %v542_v0  ;;  %326 = vmatprep.mubr.f32.mxu1 %v542_v0 }
  0x28   : > { %458 = vmatmul.mubr.msk.f32.gmra.mrb[2].mxu0 %vm207_vm0, %v184_v27  ;;  %462 = vmatmul.mubr.msk.f32.gmra.mrb[2].mxu1 %vm207_vm0, %v188_v28 }
  0x29   : > { %308 = vmatprep.mubr.f32.mxu0 %v542_v0  ;;  %332 = vmatprep.mubr.f32.mxu1 %v542_v0 }
  0x2c   : > { %459 = vmatmul.mubr.msk.f32.gmra.mrb[4].mxu0 %vm207_vm0, %v185_v29  ;;  %463 = vmatmul.mubr.msk.f32.gmra.mrb[4].mxu1 %vm207_vm0, %v189_v30 }
  0x2d   : > { %314 = vmatprep.mubr.f32.mxu0 %v542_v0  ;;  %338 = vmatprep.mubr.f32.mxu1 %v542_v0 }
  0x30   : > { %460 = vmatmul.mubr.msk.f32.gmra.mrb[6].mxu0 %vm207_vm0, %v186_v31  ;;  %464 = vmatmul.mubr.msk.f32.gmra.mrb[6].mxu1 %vm207_vm0, %v190_v32 }
  0xf7   : > { %v298_v33 = vpop.f32.mrb[0].mxu0  ;;  %v322_v34 = vpop.f32.mrb[0].mxu1 }
  0xf8   : > { %345 = vst [vmem:[%s647_s7] sm:$0xff] %v298_v33  ;;  %353 = vst [vmem:[%s647_s7 + $0x40] sm:$0xff] %v322_v34  ;;  %v300_v35 = vpop.f32.mrb[1].mxu0  ;;  %v324_v36 = vpop.f32.mrb[1].mxu1 }
  0xf9   : > { %346 = vst [vmem:[%s647_s7 + $0x8] sm:$0xff] %v300_v35  ;;  %354 = vst [vmem:[%s647_s7 + $0x48] sm:$0xff] %v324_v36 }
  0xfb   : > { %v304_v37 = vpop.f32.mrb[2].mxu0  ;;  %v328_v38 = vpop.f32.mrb[2].mxu1 }
  0xfc   : > { %347 = vst [vmem:[%s647_s7 + $0x10] sm:$0xff] %v304_v37  ;;  %355 = vst [vmem:[%s647_s7 + $0x50] sm:$0xff] %v328_v38  ;;  %v306_v39 = vpop.f32.mrb[3].mxu0  ;;  %v330_v40 = vpop.f32.mrb[3].mxu1 }
  0xfd   : > { %348 = vst [vmem:[%s647_s7 + $0x18] sm:$0xff] %v306_v39  ;;  %356 = vst [vmem:[%s647_s7 + $0x58] sm:$0xff] %v330_v40 }
  0xff   : > { %v310_v41 = vpop.f32.mrb[4].mxu0  ;;  %v334_v42 = vpop.f32.mrb[4].mxu1 }
 0x100   : > { %349 = vst [vmem:[%s647_s7 + $0x20] sm:$0xff] %v310_v41  ;;  %357 = vst [vmem:[%s647_s7 + $0x60] sm:$0xff] %v334_v42  ;;  %v312_v43 = vpop.f32.mrb[5].mxu0  ;;  %v336_v44 = vpop.f32.mrb[5].mxu1 }
 0x101   : > { %350 = vst [vmem:[%s647_s7 + $0x28] sm:$0xff] %v312_v43  ;;  %358 = vst [vmem:[%s647_s7 + $0x68] sm:$0xff] %v336_v44 }
 0x103   : > { %v316_v45 = vpop.f32.mrb[6].mxu0  ;;  %v340_v46 = vpop.f32.mrb[6].mxu1 }
 0x104   : > { %351 = vst [vmem:[%s647_s7 + $0x30] sm:$0xff] %v316_v45  ;;  %359 = vst [vmem:[%s647_s7 + $0x70] sm:$0xff] %v340_v46  ;;  %v318_v47 = vpop.f32.mrb[7].mxu0  ;;  %v342_v48 = vpop.f32.mrb[7].mxu1 }
 0x105   : > { %352 = vst [vmem:[%s647_s7 + $0x38] sm:$0xff] %v318_v47  ;;  %360 = vst [vmem:[%s647_s7 + $0x78] sm:$0xff] %v342_v48 }
 0x106 PF: > { %s12_s11 = sadd.s32 1, %s540_s11   ;;  %s677_s9 = smov %s536_s10 }
 0x107   : > { %p9_p5 = scmp.ge.s32.totalorder %s12_s11, 4   ;;  %s678_s10 = smov %s680_s12 }
 0x109   :  { %11 = sbr.rel (!%p9_p5) target bundleno = 2 (0x2), region = 58 }

</bundles_post_ra>
